<compile_context>
chip_gen: v7x
topology: tpu7x:2x2x1
jax: 0.10.0
libtpu: 0.0.40
codegen_flags: <defaults>
</compile_context>

<pallas_src>
import functools

import jax
import jax.numpy as jnp
from jax.experimental import pallas as pl
from jax.experimental.pallas import tpu as pltpu


def _focal_loss_kernel(pred_ref, target_ref, out_ref, *, gamma, batch_size,
                       block_rows, tiles_per_core, num_tiles):
    """One batch tile: per-row CE + focal modulation, accumulated into out_ref."""
    k_id = pl.program_id(1)
    global_tile = pl.program_id(0) * tiles_per_core + k_id

    @pl.when(k_id == 0)
    def _init():
        out_ref[...] = jnp.zeros_like(out_ref)

    logits = pred_ref[...].astype(jnp.float32)                  # (TB, C)
    tb, c = logits.shape

    # Per-row cross entropy via stable logsumexp.  z_t is gathered from the
    # raw logits (not `shifted`) so logits - m -> exp -> sum can be fused per
    # vreg instead of materializing an extra full (TB, C) f32 buffer.
    m = jnp.max(logits, axis=-1, keepdims=True)                 # (TB, 1)
    lse = jnp.log(jnp.sum(jnp.exp(logits - m), axis=-1, keepdims=True))
    col = jax.lax.broadcasted_iota(jnp.int32, (tb, c), 1)
    onehot = col == target_ref[...]                             # (TB, C)
    z_t = jnp.sum(jnp.where(onehot, logits, 0.0), axis=-1, keepdims=True)
    ce = (m + lse) - z_t                                        # (TB, 1), >= 0

    # Focal modulation (1 - p)**gamma * ce.
    if gamma == 0:
        focal = ce                         # (1 - p)**0 == 1, matches torch
    else:
        p = jnp.exp(-ce)
        # clamp tiny round-off negatives: float-exponent pow -> exp(g*log(x))
        base = jnp.maximum(1.0 - p, 0.0)
        focal = (base ** gamma) * ce

    # Full tiles accumulate unmasked; only the last logical tile (possibly
    # ragged) and any clamped overshoot tiles pay for the row mask.
    @pl.when(global_tile < num_tiles - 1)
    def _acc_full():
        out_ref[...] += jnp.sum(focal, axis=0, keepdims=True)

    @pl.when(global_tile >= num_tiles - 1)
    def _acc_masked():
        row = (jax.lax.broadcasted_iota(jnp.int32, (tb, 1), 0)
               + global_tile * block_rows)
        masked = jnp.where(row < batch_size, focal, 0.0)   # true select: padded
        out_ref[...] += jnp.sum(masked, axis=0, keepdims=True)  # garbage stays out


def _vmem_capacity_bytes():
    """Physical VMEM per TensorCore (128 MiB v5e/v6e, 64 MiB v7x)."""
    try:
        cap = getattr(pltpu.get_tpu_info(), "vmem_capacity_bytes", None)
        if cap:
            return int(cap)
    except Exception:
        pass
    return 64 * 1024 * 1024  # conservative fallback (v7x per-core)


def _choose_block_rows(batch, n_classes, itemsize, vmem_limit_bytes):
    """Largest batch tile whose *full* working set fits comfortably in VMEM.

    Per-row footprint ~ 2 * C * itemsize   (input tile, double-buffered)
                      + 4 * C * 4          (live f32 (TB, C) temporaries:
                                             f32 cast, exp chain, onehot select,
                                             plus slack)
    Total kept under ~half of vmem_limit_bytes to leave headroom for the
    pipeline, target tiles and compiler scratch.
    """
    budget = vmem_limit_bytes // 2
    per_row = n_classes * (2 * itemsize + 4 * 4)
    rows = budget // max(1, per_row)
    rows = max(8, (rows // 8) * 8)          # sublane multiple of 8
    rows = min(rows, 1 << 16)               # keep per-tile shapes sane
    return batch if batch <= rows else rows  # full dim also satisfies tiling rule


def focal_loss(pred, target, *, gamma=0, eps=1e-7, block_rows=None,
               num_cores=2, vmem_limit_bytes=None):
    """JAX/Pallas equivalent of FocalLoss(gamma, eps)(pred, target)."""
    del eps  # unused in the PyTorch forward as well
    b, c = pred.shape

    if vmem_limit_bytes is None:
        cap = _vmem_capacity_bytes()
        # ~3/4 of physical VMEM: 96 MiB on v5e/v6e (128 MiB), 48 MiB on v7x (64 MiB)
        vmem_limit_bytes = min((cap * 3) // 4, 96 * 1024 * 1024)
    if block_rows is None:
        block_rows = _choose_block_rows(b, c, pred.dtype.itemsize,
                                        vmem_limit_bytes)

    num_tiles = pl.cdiv(b, block_rows)
    num_cores = max(1, min(num_cores, num_tiles))
    tiles_per_core = pl.cdiv(num_tiles, num_cores)

    g = gamma
    if isinstance(g, float) and float(g).is_integer():
        g = int(g)  # integer_pow: exact & cheap for integer exponents

    kernel = functools.partial(
        _focal_loss_kernel, gamma=g, batch_size=b, block_rows=block_rows,
        tiles_per_core=tiles_per_core, num_tiles=num_tiles)

    def tile_map(p, k):
        # Clamp so overshoot steps (p*tiles_per_core + k >= num_tiles) re-read
        # the last valid tile; their contribution is masked to zero in-kernel.
        return (jnp.minimum(p * tiles_per_core + k, num_tiles - 1), 0)

    partials = pl.pallas_call(
        kernel,
        out_shape=jax.ShapeDtypeStruct((num_cores, 1, 1), jnp.float32),
        grid=(num_cores, tiles_per_core),
        in_specs=[
            pl.BlockSpec((block_rows, c), tile_map),   # logits tile, native dtype
            pl.BlockSpec((block_rows, 1), tile_map),   # target indices
        ],
        # one private (1,1) partial-sum block per core (leading dim squeezed)
        out_specs=pl.BlockSpec((None, 1, 1), lambda p, k: (p, 0, 0)),
        compiler_params=pltpu.CompilerParams(
            dimension_semantics=("parallel", "arbitrary"),
            vmem_limit_bytes=int(vmem_limit_bytes),
        ),
    )(pred, target.reshape(b, 1).astype(jnp.int32))

    return jnp.sum(partials) / jnp.float32(b)


def _reference(pred, target, gamma):
    logp = jax.nn.log_softmax(pred.astype(jnp.float32), axis=-1)
    ce = -jnp.take_along_axis(logp, target[:, None], axis=-1)[:, 0]
    p = jnp.exp(-ce)
    return jnp.mean(((1.0 - p) ** gamma) * ce)


if __name__ == "__main__":
    key = jax.random.PRNGKey(0)
    k1, k2 = jax.random.split(key)
    B, C = 20, 5   # not a multiple of block_rows=8 -> ragged + overshoot masking
    pred = jax.random.normal(k1, (B, C), dtype=jnp.float32)
    target = jax.random.randint(k2, (B,), 0, C, dtype=jnp.int32)

    for gamma in (0, 2, 2.5):
        # forced small tile: ragged last tile + 2-way "parallel" split w/ overshoot
        loss_a = jax.block_until_ready(
            focal_loss(pred, target, gamma=gamma, block_rows=8))
        # auto tile sizing: single full-batch tile, single core
        loss_b = jax.block_until_ready(focal_loss(pred, target, gamma=gamma))
        ref = _reference(pred, target, gamma)
        assert jnp.allclose(loss_a, ref, atol=1e-5, rtol=1e-4), (gamma, loss_a, ref)
        assert jnp.allclose(loss_b, ref, atol=1e-5, rtol=1e-4), (gamma, loss_b, ref)

    print("KERNEL_OK")
</pallas_src>

<mosaic_0001>
module attributes {stable_mosaic.version = 11 : i64} {
  func.func @_focal_loss_kernel(%arg0: i32, %arg1: i32, %arg2: memref<8x5xf32, #tpu.memory_space<vmem>>, %arg3: memref<8x1xi32, #tpu.memory_space<vmem>>, %arg4: memref<1x1x1xf32, #tpu.memory_space<vmem>>) attributes {dimension_semantics = [#tpu.dimension_semantics<parallel>, #tpu.dimension_semantics<arbitrary>], iteration_bounds = array<i64: 2, 2>, scalar_prefetch = 0 : i64, scratch_operands = 0 : i64, tpu.core_type = #tpu.core_type<tc>, window_params = [{transform_indices = @transform_0, window_bounds = array<i64: 8, 5>}, {transform_indices = @transform_1, window_bounds = array<i64: 8, 1>}, {transform_indices = @transform_2, window_bounds = array<i64: 1, 1, 1>}]} {
    %c2_i32 = arith.constant 2 : i32
    %0 = arith.muli %arg0, %c2_i32 : i32
    %1 = arith.addi %0, %arg1 : i32
    %c0_i32 = arith.constant 0 : i32
    %2 = arith.cmpi eq, %arg1, %c0_i32 : i32
    %3 = arith.extui %2 : i1 to i32
    %c0_i32_0 = arith.constant 0 : i32
    %4 = arith.cmpi ne, %3, %c0_i32_0 : i32
    scf.if %4 {
      %cst_11 = arith.constant 0.000000e+00 : f32
      %30 = vector.broadcast %cst_11 : f32 to vector<1x1xf32>
      %c0_12 = arith.constant 0 : index
      %c0_13 = arith.constant 0 : index
      %c0_14 = arith.constant 0 : index
      %31 = vector.load %arg4[%c0_12, %c0_13, %c0_14] : memref<1x1x1xf32, #tpu.memory_space<vmem>>, vector<1x1x1xf32>
      %32 = vector.shape_cast %31 : vector<1x1x1xf32> to vector<1x1xf32>
      %33 = vector.shape_cast %30 : vector<1x1xf32> to vector<1x1x1xf32>
      tpu.vector_store %arg4[%c0_12, %c0_13, %c0_14], %33 {strides = array<i32>} : memref<1x1x1xf32, #tpu.memory_space<vmem>>, vector<1x1x1xf32>,
    } else {
    }
    %c0 = arith.constant 0 : index
    %c0_1 = arith.constant 0 : index
    %5 = vector.load %arg2[%c0, %c0_1] : memref<8x5xf32, #tpu.memory_space<vmem>>, vector<8x5xf32>
    %cst = arith.constant dense<0xFF800000> : vector<8xf32>
    %6 = vector.multi_reduction <maximumf>, %5, %cst [1] : vector<8x5xf32> to vector<8xf32>
    %7 = vector.shape_cast %6 : vector<8xf32> to vector<8x1xf32>
    %8 = vector.broadcast %7 : vector<8x1xf32> to vector<8x5xf32>
    %9 = arith.subf %5, %8 : vector<8x5xf32>
    %10 = math.exp %9 : vector<8x5xf32>
    %cst_2 = arith.constant dense<0.000000e+00> : vector<8xf32>
    %11 = vector.multi_reduction <add>, %10, %cst_2 [1] : vector<8x5xf32> to vector<8xf32>
    %12 = vector.shape_cast %11 : vector<8xf32> to vector<8x1xf32>
    %13 = math.log %12 : vector<8x1xf32>
    %14 = tpu.iota {dimensions = array<i32: 1>} : vector<8x5xi32>
    %c0_3 = arith.constant 0 : index
    %c0_4 = arith.constant 0 : index
    %15 = vector.load %arg3[%c0_3, %c0_4] : memref<8x1xi32, #tpu.memory_space<vmem>>, vector<8x1xi32>
    %16 = vector.broadcast %15 : vector<8x1xi32> to vector<8x5xi32>
    %17 = arith.cmpi eq, %14, %16 : vector<8x5xi32>
    %cst_5 = arith.constant 0.000000e+00 : f32
    %18 = vector.broadcast %cst_5 : f32 to vector<8x5xf32>
    %19 = arith.select %17, %5, %18 : vector<8x5xi1>, vector<8x5xf32>
    %cst_6 = arith.constant dense<0.000000e+00> : vector<8xf32>
    %20 = vector.multi_reduction <add>, %19, %cst_6 [1] : vector<8x5xf32> to vector<8xf32>
    %21 = vector.shape_cast %20 : vector<8xf32> to vector<8x1xf32>
    %22 = arith.addf %7, %13 : vector<8x1xf32>
    %23 = arith.subf %22, %21 : vector<8x1xf32>
    %c2_i32_7 = arith.constant 2 : i32
    %24 = arith.cmpi slt, %1, %c2_i32_7 : i32
    %25 = arith.extui %24 : i1 to i32
    %c0_i32_8 = arith.constant 0 : i32
    %26 = arith.cmpi ne, %25, %c0_i32_8 : i32
    scf.if %26 {
      %c0_11 = arith.constant 0 : index
      %c0_12 = arith.constant 0 : index
      %c0_13 = arith.constant 0 : index
      %30 = vector.load %arg4[%c0_11, %c0_12, %c0_13] : memref<1x1x1xf32, #tpu.memory_space<vmem>>, vector<1x1x1xf32>
      %31 = vector.shape_cast %30 : vector<1x1x1xf32> to vector<1x1xf32>
      %cst_14 = arith.constant dense<0.000000e+00> : vector<1xf32>
      %32 = vector.multi_reduction <add>, %23, %cst_14 [0] : vector<8x1xf32> to vector<1xf32>
      %33 = vector.shape_cast %32 : vector<1xf32> to vector<1x1xf32>
      %34 = arith.addf %31, %33 : vector<1x1xf32>
      %c0_15 = arith.constant 0 : index
      %c0_16 = arith.constant 0 : index
      %c0_17 = arith.constant 0 : index
      %35 = vector.load %arg4[%c0_15, %c0_16, %c0_17] : memref<1x1x1xf32, #tpu.memory_space<vmem>>, vector<1x1x1xf32>
      %36 = vector.shape_cast %35 : vector<1x1x1xf32> to vector<1x1xf32>
      %37 = vector.shape_cast %34 : vector<1x1xf32> to vector<1x1x1xf32>
      tpu.vector_store %arg4[%c0_15, %c0_16, %c0_17], %37 {strides = array<i32>} : memref<1x1x1xf32, #tpu.memory_space<vmem>>, vector<1x1x1xf32>,
    } else {
    }
    %c2_i32_9 = arith.constant 2 : i32
    %27 = arith.cmpi sge, %1, %c2_i32_9 : i32
    %28 = arith.extui %27 : i1 to i32
    %c0_i32_10 = arith.constant 0 : i32
    %29 = arith.cmpi ne, %28, %c0_i32_10 : i32
    scf.if %29 {
      %30 = tpu.iota {dimensions = array<i32: 0>} : vector<8x1xi32>
      %c8_i32 = arith.constant 8 : i32
      %31 = arith.muli %1, %c8_i32 : i32
      %32 = vector.broadcast %31 : i32 to vector<8x1xi32>
      %33 = arith.addi %30, %32 : vector<8x1xi32>
      %c20_i32 = arith.constant 20 : i32
      %34 = vector.broadcast %c20_i32 : i32 to vector<8x1xi32>
      %35 = arith.cmpi slt, %33, %34 : vector<8x1xi32>
      %cst_11 = arith.constant 0.000000e+00 : f32
      %36 = vector.broadcast %cst_11 : f32 to vector<8x1xf32>
      %37 = arith.select %35, %23, %36 : vector<8x1xi1>, vector<8x1xf32>
      %c0_12 = arith.constant 0 : index
      %c0_13 = arith.constant 0 : index
      %c0_14 = arith.constant 0 : index
      %38 = vector.load %arg4[%c0_12, %c0_13, %c0_14] : memref<1x1x1xf32, #tpu.memory_space<vmem>>, vector<1x1x1xf32>
      %39 = vector.shape_cast %38 : vector<1x1x1xf32> to vector<1x1xf32>
      %cst_15 = arith.constant dense<0.000000e+00> : vector<1xf32>
      %40 = vector.multi_reduction <add>, %37, %cst_15 [0] : vector<8x1xf32> to vector<1xf32>
      %41 = vector.shape_cast %40 : vector<1xf32> to vector<1x1xf32>
      %42 = arith.addf %39, %41 : vector<1x1xf32>
      %c0_16 = arith.constant 0 : index
      %c0_17 = arith.constant 0 : index
      %c0_18 = arith.constant 0 : index
      %43 = vector.load %arg4[%c0_16, %c0_17, %c0_18] : memref<1x1x1xf32, #tpu.memory_space<vmem>>, vector<1x1x1xf32>
      %44 = vector.shape_cast %43 : vector<1x1x1xf32> to vector<1x1xf32>
      %45 = vector.shape_cast %42 : vector<1x1xf32> to vector<1x1x1xf32>
      tpu.vector_store %arg4[%c0_16, %c0_17, %c0_18], %45 {strides = array<i32>} : memref<1x1x1xf32, #tpu.memory_space<vmem>>, vector<1x1x1xf32>,
    } else {
    }
    return
  }
  func.func @transform_0(%arg0: i32, %arg1: i32) -> (i32, i32) {
    %c2_i32 = arith.constant 2 : i32
    %0 = arith.muli %arg0, %c2_i32 : i32
    %1 = arith.addi %0, %arg1 : i32
    %c2_i32_0 = arith.constant 2 : i32
    %2 = arith.minsi %1, %c2_i32_0 : i32
    %c0_i32 = arith.constant 0 : i32
    %c0_i32_1 = arith.constant 0 : i32
    return %2, %c0_i32 : i32, i32
  }
  func.func @transform_1(%arg0: i32, %arg1: i32) -> (i32, i32) {
    %c2_i32 = arith.constant 2 : i32
    %0 = arith.muli %arg0, %c2_i32 : i32
    %1 = arith.addi %0, %arg1 : i32
    %c2_i32_0 = arith.constant 2 : i32
    %2 = arith.minsi %1, %c2_i32_0 : i32
    %c0_i32 = arith.constant 0 : i32
    %c0_i32_1 = arith.constant 0 : i32
    return %2, %c0_i32 : i32, i32
  }
  func.func @transform_2(%arg0: i32, %arg1: i32) -> (i32, i32, i32) {
    %c0_i32 = arith.constant 0 : i32
    %c0_i32_0 = arith.constant 0 : i32
    %c0_i32_1 = arith.constant 0 : i32
    return %arg0, %c0_i32, %c0_i32_0 : i32, i32, i32
  }
}

</mosaic_0001>

<bundles_post_ra>
// kernel: tpu_custom_call.1
= control target key start
LH: loop header
LB: loop body
LE: loop exit
PB: predicated region body
PF: predicated region fallthrough
CT: control target
= control target key end

     0   :  { %s491_s9 = smov 0   ;;  %s493_s10 = smov 0   ;;  %s567_s0 = inlined_call_operand.vmem [shape: f32[20,5], index: 0, kind: input, shape index: {}]   ;;  %s568_s1 = inlined_call_operand.vmem [shape: s32[20,1], index: 1, kind: input, shape index: {}]   ;;  %s569_s2 = inlined_call_operand.vmem [shape: f32[2,1,1], index: 2, kind: output, shape index: {}]  }
   0x1   :  { %s495_s11 = smov 0   ;;  %s497_s12 = smov 0  }
   0x2   :  { %s499_s13 = smov 0  }
   0x3 LB: > { %s21_s14 = sadd.s32 1, %s464_s11  ;;  %s24_s15 = sadd.s32 1, %s468_s12  ;;  %s472_s13 = sphi %s499_s13, %s12_s13   ;;  %s468_s12 = sphi %s497_s12, %s573_s12   ;;  %s464_s11 = sphi %s495_s11, %s572_s11   ;;  %s460_s10 = sphi %s493_s10, %s571_s10   ;;  %s456_s9 = sphi %s491_s9, %s570_s9  }
   0x4   : > { %p22_p0 = scmp.ge.s32.totalorder %s21_s14, 2  ;;  %p369_p1 = scmp.ge.s32.totalorder %s472_s13, 1 }
   0x5   : > { %p164_p2 = scmp.lt.s32.totalorder %s472_s13, 5 }
   0x6   : > { %s575_s14 = smov (%p22_p0, %s21_s14), 0  ;;  %s577_s15 = smov (!%p22_p0, %s24_s15), %s468_s12 }
   0x7   : > { %p165_p3 = pnand %p369_p1, %p164_p2  ;;  %p26_p4 = scmp.ge.s32.totalorder %s577_s15, 2 }
   0x8   : > { %s370_s16 = sshll.u32 (!%p165_p3), %s460_s10, 1  ;;  %p219_p5 = scmp.lt.s32.totalorder (!%p165_p3), %s460_s10, 1 }
   0x9   : > { %s579_s15 = smov (%p26_p4, %s577_s15), 0  ;;  %168 = sbr.rel (%p165_p3) target bundleno = 378 (0x17a), region = 28 }
   0xa   : > { %s521_s17 = sadd.s32 (!%p165_p3), %s456_s9, %s370_s16  ;;  %p381_p7 = scmp.ne.s32.totalorder (!%p165_p3), %s456_s9, 0 }
   0xb   : > { %p197_p6 = scmp.lt.s32.totalorder (!%p165_p3), %s521_s17, 2 }
  0x10   : > { %s581_s10 = smov (!%p219_p5, %s460_s10), 1  ;;  %227 = sbr.rel (%p381_p7) target bundleno = 23 (0x17), region = 32 }
  0x11   : > { %s198_s18 = scalar_select %p197_p6, %s521_s17, 2 }
  0x12   : > { %s530_s21 = scalar_lea.vmem %s569_s2, %s581_s10  ;;  %vm228_vm0 = vcmask (!%p381_p7), 0   ;;  %v474_v0 = vmov (!%p381_p7), 0.0  }
  0x13   : > { %s583_s18 = smov (!%p197_p6, %s198_s18), 2  ;;  %229 = vst.msk [vmem:[%s530_s21] sm:$0x1] (!%p381_p7), %vm228_vm0, %v474_v0 }
  0x14   : > { %s374_s22 = sshll.u32 %s583_s18, 3 }
  0x15   : > { %s202_s25 = scalar_lea.vmem %s567_s0, %s374_s22  ;;  %s214_s28 = scalar_lea.vmem %s568_s1, %s374_s22 }
  0x17 PF: > { %v230_v1 = vld [vmem:[%s202_s25] sm:$0xff]  ;;  %vm231_vm1 = vcmask 39936   ;;  %v475_v3 = vmov 0   ;;  %v243_v8 = vlaneseq  ;;  %p382_p8 = scmp.ge.s32.totalorder %s521_s17, 2 }
  0x18   : > { %v232_v2 = vsel %vm231_vm1, %v230_v1, -inf  ;;  %429 = vset.pattern.permute.xlu0 %v475_v3  ;;  %v245_v4 = vld [vmem:[%s214_s28] sm:$0xff]  ;;  %vm268_vm3 = vcmask (!%p382_p8), 0  }
  0x19   : > { %233 = vmax.xlane.f32.xlu0 %v232_v2  ;;  %v244_v9 = vand.u32 127, %v243_v8 }
  0x1a   : > { %v260_v26 = vld [vmem:[%s530_s21] sm:$0x1] (!%p382_p8) }
  0x2f   : > { %247 = vperm.xlu0 %429, %v245_v4  }
  0xa6   : > { %v234_v5 = vpop.xlane.xlu0 %233 }
  0xa7   : > { %v235_v6 = vsub.f32 %v230_v1, %v234_v5 }
  0xa9   : > { %v236_v7 = vmul.f32 1.442695, %v235_v6 }
  0xab   : > { %430 = vpow2.f32 %v236_v7 }
  0xae   : > { %v248_v10 = vpop.permute.xlu0 %247 }
  0xaf   : > { %vm249_vm2 = vcmp.eq.s32.totalorder %v244_v9, %v248_v10 }
  0xb0   : > { %v250_v12 = vsel %vm249_vm2, %v230_v1, 0.0 }
  0xb1   : > { %v251_v14 = vsel %vm231_vm1, %v250_v12, 0.0 }
  0xb5   : > { %v431_v11 = vpop.eup %430 }
  0xb6   : > { %v238_v13 = vsel %vm231_vm1, %v431_v11, 0.0 }
  0xb7   : > { %239 = vadd.xlane.f32.xlu1 %v238_v13 }
  0xbb   : > { %252 = vadd.xlane.f32.xlu1 %v251_v14 }
 0x144   : > { %v240_v15 = vpop.xlane.xlu1 %239 }
 0x145   : > { %432 = vlog2.f32 %v240_v15 }
 0x148   : > { %v253_v18 = vpop.xlane.xlu1 %252 }
 0x14e   : > { %259 = sbr.rel (%p382_p8) target bundleno = 357 (0x165), region = 36 }
 0x14f   : > { %v433_v16 = vpop.eup %432 }
 0x150   : > { %v242_v17 = vmul.f32 0.6931472, %v433_v16 }
 0x152   : > { %v254_v19 = vadd.f32 %v242_v17, %v234_v5 }
 0x154   : > { %v255_v20 = vsub.f32 %v254_v19, %v253_v18 }
 0x156   : > { %v261_v21 = vrot.slane %v255_v20, 4 }
 0x158   : > { %v262_v22 = vadd.f32 %v261_v21, %v255_v20 }
 0x15a   : > { %v263_v23 = vrot.slane %v262_v22, 2 }
 0x15c   : > { %v264_v24 = vadd.f32 %v263_v23, %v262_v22 }
 0x15e   : > { %v265_v25 = vrot.slane %v264_v24, 1 }
 0x160   : > { %v266_v27 = vadd.f32 %v265_v25, %v264_v24 }
 0x162   : > { %v267_v28 = vadd.f32 %v266_v27, %v260_v26 }
 0x164   : > { %269 = vst.msk [vmem:[%s530_s21] sm:$0x1] %vm268_vm3, %v267_v28 }
 0x165 PF: > { %273 = sbr.rel (%p197_p6) target bundleno = 378 (0x17a), region = 40  ;;  %v275_v29 = vshrl.u32 (!%p197_p6), %v243_v8, 7  ;;  %s384_s29 = sshll.u32 (!%p197_p6), %s521_s17, 3  ;;  %vm289_vm5 = vcmask (!%p197_p6), 0  }
 0x166   : > { %v277_v30 = vstv (!%p197_p6), %s384_s29 }
 0x167   : > { %v278_v31 = vadd.s32 (!%p197_p6), %v277_v30, %v275_v29 }
 0x169   : > { %vm279_vm4 = vcmp.lt.s32.totalorder (!%p197_p6), %v278_v31, 20 }
 0x16a   : > { %v280_v32 = vsel (!%p197_p6), %vm279_vm4, %v255_v20, 0.0 }
 0x16b   : > { %v282_v33 = vrot.slane (!%p197_p6), %v280_v32, 4  ;;  %v281_v38 = vld [vmem:[%s530_s21] sm:$0x1] (!%p197_p6) }
 0x16d   : > { %v283_v34 = vadd.f32 %v282_v33, %v280_v32 }
 0x16f   : > { %v284_v35 = vrot.slane %v283_v34, 2 }
 0x171   : > { %v285_v36 = vadd.f32 %v284_v35, %v283_v34 }
 0x173   : > { %v286_v37 = vrot.slane %v285_v36, 1 }
 0x175   : > { %v287_v39 = vadd.f32 %v286_v37, %v285_v36 }
 0x177   : > { %v288_v40 = vadd.f32 %v287_v39, %v281_v38 }
 0x179   : > { %290 = vst.msk [vmem:[%s530_s21] sm:$0x1] %vm289_vm5, %v288_v40 }
 0x17a PF: > { %s12_s13 = sadd.s32 1, %s472_s13   ;;  %s570_s9 = smov %s464_s11 }
 0x17b   : > { %p9_p9 = scmp.ge.s32.totalorder %s12_s13, 6   ;;  %s571_s10 = smov %s468_s12 }
 0x17c   : > { %s572_s11 = smov %s575_s14  ;;  %s573_s12 = smov %s579_s15 }
 0x17d   :  { %11 = sbr.rel (!%p9_p9) target bundleno = 3 (0x3), region = 73 }

</bundles_post_ra>
